<compile_context>
chip_gen: v5e
topology: v5e:2x2
jax: 0.10.0
libtpu: 0.0.40
codegen_flags: <defaults>
</compile_context>

<pallas_src>
import jax
import jax.numpy as jnp
from jax import lax
from jax.experimental import pallas as pl
from jax.experimental.pallas import tpu as pltpu


def _round_up(x, m):
    return ((x + m - 1) // m) * m


def _pearsoncc_kernel(p_ref, t_ref, absr_ref, valid_ref):
    p = p_ref[...].astype(jnp.float32)      # (N, TC)
    t = t_ref[...].astype(jnp.float32)      # (N, TC)

    n = p.shape[0]
    inv_n = jnp.float32(1.0 / n)

    # Centered two-pass moments (numerically safer than raw moments; constant
    # columns give an exact zero variance -> masked like torch's NaN).
    pm = jnp.sum(p, axis=0, keepdims=True) * inv_n      # (1, TC)
    tm = jnp.sum(t, axis=0, keepdims=True) * inv_n      # (1, TC)
    pc = p - pm
    tc = t - tm

    cov = jnp.sum(pc * tc, axis=0, keepdims=True)        # (1, TC)
    vp = jnp.sum(pc * pc, axis=0, keepdims=True)          # (1, TC)
    vt = jnp.sum(tc * tc, axis=0, keepdims=True)          # (1, TC)

    denom_sq = vp * vt
    valid = denom_sq > 0.0                                 # zero variance -> NaN in torch
    inv_denom = lax.rsqrt(jnp.where(valid, denom_sq, 1.0))  # EUP rsqrt (free slot)
    abs_r = jnp.where(valid, jnp.abs(cov * inv_denom), 0.0)

    absr_ref[...] = abs_r
    valid_ref[...] = valid.astype(jnp.float32)


def pearson_cc(preds, targets, *, max_col_tile=4096):
    """Pallas implementation of PearsonCC.forward.  preds/targets: [B, N, D]."""
    B, N, D = preds.shape
    C = B * D

    # [B, N, D] -> [N, B*D]: reduction axis on sublanes, independent columns on lanes.
    p2 = jnp.transpose(preds, (1, 0, 2)).reshape(N, C)
    t2 = jnp.transpose(targets, (1, 0, 2)).reshape(N, C)

    # Lane-dense column tile: multiple of 128, sized so 2 inputs x 2 pipeline
    # buffers (~4 blocks) stay inside the default scoped VMEM on every generation.
    itemsize = jnp.dtype(p2.dtype).itemsize
    bytes_per_col = N * itemsize
    budget_cols = max(128, ((6 * 1024 * 1024) // bytes_per_col) // 128 * 128)
    tc = min(budget_cols, max_col_tile, _round_up(C, 128))
    c_pad = _round_up(C, tc)
    if c_pad != C:
        pad = c_pad - C   # zero columns -> zero variance -> masked out as invalid
        p2 = jnp.pad(p2, ((0, 0), (0, pad)))
        t2 = jnp.pad(t2, ((0, 0), (0, pad)))

    grid = (c_pad // tc,)
    abs_r, valid = pl.pallas_call(
        _pearsoncc_kernel,
        out_shape=(
            jax.ShapeDtypeStruct((1, c_pad), jnp.float32),
            jax.ShapeDtypeStruct((1, c_pad), jnp.float32),
        ),
        grid_spec=pltpu.PrefetchScalarGridSpec(
            num_scalar_prefetch=0,
            grid=grid,
            in_specs=[
                pl.BlockSpec((N, tc), lambda j: (0, j)),
                pl.BlockSpec((N, tc), lambda j: (0, j)),
            ],
            out_specs=[
                pl.BlockSpec((1, tc), lambda j: (0, j)),
                pl.BlockSpec((1, tc), lambda j: (0, j)),
            ],
        ),
        compiler_params=pltpu.CompilerParams(
            dimension_semantics=("parallel",),   # no cross-step dependence
        ),
    )(p2, t2)

    abs_r = abs_r[0, :C].reshape(B, D)
    valid = valid[0, :C].reshape(B, D)
    # nanmean(|r|) per batch; 0/0 -> NaN when no valid column, matching torch.nanmean.
    nanmean = jnp.sum(abs_r, axis=1) / jnp.sum(valid, axis=1)
    return jnp.mean(1.0 - nanmean)


def _reference(preds, targets):
    # Pure-JAX reference mirroring the torch module.
    pm = preds.mean(axis=1, keepdims=True)
    tm = targets.mean(axis=1, keepdims=True)
    pc = preds - pm
    tc = targets - tm
    cov = (pc * tc).sum(axis=1)
    vp = (pc * pc).sum(axis=1)
    vt = (tc * tc).sum(axis=1)
    denom = jnp.sqrt(vp * vt)
    valid = denom > 0.0
    r = cov / jnp.where(valid, denom, 1.0)
    abs_r = jnp.where(valid, jnp.abs(r), 0.0)
    nanmean = abs_r.sum(axis=1) / valid.sum(axis=1)
    return jnp.mean(1.0 - nanmean)


if __name__ == "__main__":
    key = jax.random.PRNGKey(0)
    k1, k2 = jax.random.split(key)
    B, N, D = 2, 16, 8
    preds = jax.random.normal(k1, (B, N, D), dtype=jnp.float32)
    targets = jax.random.normal(k2, (B, N, D), dtype=jnp.float32)
    # Include a zero-variance column to exercise the nanmean (NaN-masking) path.
    targets = targets.at[0, :, 3].set(1.0)

    out = jax.block_until_ready(pearson_cc(preds, targets))
    ref = jax.block_until_ready(_reference(preds, targets))
    assert jnp.allclose(out, ref, rtol=1e-5, atol=1e-5), (out, ref)
    print("KERNEL_OK")
</pallas_src>

<mosaic_0001>
module attributes {stable_mosaic.version = 11 : i64} {
  func.func @_pearsoncc_kernel(%arg0: i32, %arg1: memref<16x128xf32, #tpu.memory_space<vmem>>, %arg2: memref<16x128xf32, #tpu.memory_space<vmem>>, %arg3: memref<1x128xf32, #tpu.memory_space<vmem>>, %arg4: memref<1x128xf32, #tpu.memory_space<vmem>>) attributes {dimension_semantics = [#tpu.dimension_semantics<parallel>], iteration_bounds = array<i64: 1>, scalar_prefetch = 0 : i64, scratch_operands = 0 : i64, tpu.core_type = #tpu.core_type<tc>, window_params = [{transform_indices = @transform_0, window_bounds = array<i64: 16, 128>}, {transform_indices = @transform_1, window_bounds = array<i64: 16, 128>}, {transform_indices = @transform_2, window_bounds = array<i64: 1, 128>}, {transform_indices = @transform_3, window_bounds = array<i64: 1, 128>}]} {
    %c0 = arith.constant 0 : index
    %c0_0 = arith.constant 0 : index
    %0 = vector.load %arg1[%c0, %c0_0] : memref<16x128xf32, #tpu.memory_space<vmem>>, vector<16x128xf32>
    %c0_1 = arith.constant 0 : index
    %c0_2 = arith.constant 0 : index
    %1 = vector.load %arg2[%c0_1, %c0_2] : memref<16x128xf32, #tpu.memory_space<vmem>>, vector<16x128xf32>
    %cst = arith.constant dense<0.000000e+00> : vector<128xf32>
    %2 = vector.multi_reduction <add>, %0, %cst [0] : vector<16x128xf32> to vector<128xf32>
    %3 = vector.shape_cast %2 : vector<128xf32> to vector<1x128xf32>
    %cst_3 = arith.constant 6.250000e-02 : f32
    %4 = vector.broadcast %cst_3 : f32 to vector<1x128xf32>
    %5 = arith.mulf %3, %4 : vector<1x128xf32>
    %cst_4 = arith.constant dense<0.000000e+00> : vector<128xf32>
    %6 = vector.multi_reduction <add>, %1, %cst_4 [0] : vector<16x128xf32> to vector<128xf32>
    %7 = vector.shape_cast %6 : vector<128xf32> to vector<1x128xf32>
    %cst_5 = arith.constant 6.250000e-02 : f32
    %8 = vector.broadcast %cst_5 : f32 to vector<1x128xf32>
    %9 = arith.mulf %7, %8 : vector<1x128xf32>
    %10 = vector.broadcast %5 : vector<1x128xf32> to vector<16x128xf32>
    %11 = arith.subf %0, %10 : vector<16x128xf32>
    %12 = vector.broadcast %9 : vector<1x128xf32> to vector<16x128xf32>
    %13 = arith.subf %1, %12 : vector<16x128xf32>
    %14 = arith.mulf %11, %13 : vector<16x128xf32>
    %cst_6 = arith.constant dense<0.000000e+00> : vector<128xf32>
    %15 = vector.multi_reduction <add>, %14, %cst_6 [0] : vector<16x128xf32> to vector<128xf32>
    %16 = vector.shape_cast %15 : vector<128xf32> to vector<1x128xf32>
    %17 = arith.mulf %11, %11 : vector<16x128xf32>
    %cst_7 = arith.constant dense<0.000000e+00> : vector<128xf32>
    %18 = vector.multi_reduction <add>, %17, %cst_7 [0] : vector<16x128xf32> to vector<128xf32>
    %19 = vector.shape_cast %18 : vector<128xf32> to vector<1x128xf32>
    %20 = arith.mulf %13, %13 : vector<16x128xf32>
    %cst_8 = arith.constant dense<0.000000e+00> : vector<128xf32>
    %21 = vector.multi_reduction <add>, %20, %cst_8 [0] : vector<16x128xf32> to vector<128xf32>
    %22 = vector.shape_cast %21 : vector<128xf32> to vector<1x128xf32>
    %23 = arith.mulf %19, %22 : vector<1x128xf32>
    %cst_9 = arith.constant 0.000000e+00 : f32
    %24 = vector.broadcast %cst_9 : f32 to vector<1x128xf32>
    %25 = arith.cmpf ogt, %23, %24 : vector<1x128xf32>
    %cst_10 = arith.constant 1.000000e+00 : f32
    %26 = vector.broadcast %cst_10 : f32 to vector<1x128xf32>
    %27 = arith.select %25, %23, %26 : vector<1x128xi1>, vector<1x128xf32>
    %28 = math.rsqrt %27 : vector<1x128xf32>
    %29 = arith.mulf %16, %28 : vector<1x128xf32>
    %30 = math.absf %29 : vector<1x128xf32>
    %cst_11 = arith.constant 0.000000e+00 : f32
    %31 = vector.broadcast %cst_11 : f32 to vector<1x128xf32>
    %32 = arith.select %25, %30, %31 : vector<1x128xi1>, vector<1x128xf32>
    %c0_12 = arith.constant 0 : index
    %c0_13 = arith.constant 0 : index
    %33 = vector.load %arg3[%c0_12, %c0_13] : memref<1x128xf32, #tpu.memory_space<vmem>>, vector<1x128xf32>
    tpu.vector_store %arg3[%c0_12, %c0_13], %32 {strides = array<i32>} : memref<1x128xf32, #tpu.memory_space<vmem>>, vector<1x128xf32>,
    %34 = arith.extui %25 : vector<1x128xi1> to vector<1x128xi32>
    %35 = arith.sitofp %34 : vector<1x128xi32> to vector<1x128xf32>
    %c0_14 = arith.constant 0 : index
    %c0_15 = arith.constant 0 : index
    %36 = vector.load %arg4[%c0_14, %c0_15] : memref<1x128xf32, #tpu.memory_space<vmem>>, vector<1x128xf32>
    tpu.vector_store %arg4[%c0_14, %c0_15], %35 {strides = array<i32>} : memref<1x128xf32, #tpu.memory_space<vmem>>, vector<1x128xf32>,
    return
  }
  func.func @transform_0(%arg0: i32) -> (i32, i32) {
    %c0_i32 = arith.constant 0 : i32
    %c0_i32_0 = arith.constant 0 : i32
    return %c0_i32, %arg0 : i32, i32
  }
  func.func @transform_1(%arg0: i32) -> (i32, i32) {
    %c0_i32 = arith.constant 0 : i32
    %c0_i32_0 = arith.constant 0 : i32
    return %c0_i32, %arg0 : i32, i32
  }
  func.func @transform_2(%arg0: i32) -> (i32, i32) {
    %c0_i32 = arith.constant 0 : i32
    %c0_i32_0 = arith.constant 0 : i32
    return %c0_i32, %arg0 : i32, i32
  }
  func.func @transform_3(%arg0: i32) -> (i32, i32) {
    %c0_i32 = arith.constant 0 : i32
    %c0_i32_0 = arith.constant 0 : i32
    return %c0_i32, %arg0 : i32, i32
  }
}

</mosaic_0001>

<bundles_post_ra>
// kernel: tpu_custom_call.1
= control target key start
LH: loop header
LB: loop body
LE: loop exit
PB: predicated region body
PF: predicated region fallthrough
CT: control target
= control target key end

     0   :  { %9 = vsyncpa [#allocation3], 0  ;;  %s308_s0 = inlined_call_operand.hbm [shape: f32[16,128], index: 0, kind: input, shape index: {}]   ;;  %s309_s1 = inlined_call_operand.hbm [shape: f32[16,128], index: 1, kind: input, shape index: {}]   ;;  %s310_s2 = inlined_call_operand.hbm [shape: f32[1,128], index: 2, kind: output, shape index: {0}]   ;;  %s311_s3 = inlined_call_operand.hbm [shape: f32[1,128], index: 3, kind: output, shape index: {1}]  }
   0x1   :  { %10 = vsyncpa [#allocation6], 0 }
   0x2   :  { %11 = vsyncpa [#allocation4], 0 }
   0x3   :  { %12 = vsyncpa [#allocation9], 0  ;;  %s17_s14 = sshll.u32 %s308_s0, 4  ;;  %s266_s15 = smov [#allocation2]   ;;  %s18_s14 = int_to_ptr.hbm [resolvable:$true] %s17_s14 }
   0x4   :  { %s19_s16 = sshll.u32 %s266_s15, 4  ;;  %s30_s19 = sshll.u32 %s309_s1, 4  ;;  %s20_s16 = int_to_ptr.vmem [resolvable:$true] %s19_s16  ;;  %s31_s19 = int_to_ptr.hbm [resolvable:$true] %s30_s19 }
   0x5   :  { %s267_s20 = smov 128   ;;  %s268_s21 = smov 8  }
   0x6   :  { %25 = dma.hbm_to_vmem [thread:$0]  %s18_s14, 256, %s20_s16, [#allocation3], %s267_s20, %s267_s20, %s268_s21  }
   0x7   :  { %s269_s22 = smov [#allocation5]  }
   0x8   :  { %s32_s23 = sshll.u32 %s269_s22, 4  ;;  %s33_s23 = int_to_ptr.vmem [resolvable:$true] %s32_s23 }
   0x9   :  { %38 = dma.hbm_to_vmem [thread:$0]  %s31_s19, 256, %s33_s23, [#allocation6], %s267_s20, %s267_s20, %s268_s21  }
   0xa   :  { %258 = dma.done.wait [#allocation3], 256  }
   0xb   :  { %259 = vsyncadd [#allocation3], 4294967040 }
   0xc   :  { %260 = dma.done.wait [#allocation6], 256  }
   0xd   :  { %261 = vsyncadd [#allocation6], 4294967040  ;;  %v47_v0 = vld [vmem:[#allocation2] sm:$0xff]  ;;  %v48_v1 = vld [vmem:[#allocation2 + $0x8] sm:$0xff]  ;;  %s270_s0 = smov [#allocation8]   ;;  %s136_s26 = sshll.u32 %s311_s3, 4  ;;  %s137_s26 = int_to_ptr.hbm [resolvable:$true] %s136_s26 }
   0xe   :  { %v49_v2 = vld [vmem:[#allocation5] sm:$0xff]  ;;  %v50_v3 = vld [vmem:[#allocation5 + $0x8] sm:$0xff]  ;;  %v51_v4 = vadd.f32 %v48_v1, %v47_v0  ;;  %s134_s1 = sshll.u32 %s270_s0, 4  ;;  %v271_v49 = vmov 0.0   ;;  %s272_s3 = smov [#allocation7]   ;;  %s135_s1 = int_to_ptr.vmem [resolvable:$true] %s134_s1 }
   0xf   :  { %v59_v5 = vadd.f32 %v50_v3, %v49_v2  ;;  %s123_s27 = sshll.u32 %s272_s3, 4  ;;  %s125_s30 = sshll.u32 %s310_s2, 4  ;;  %s124_s27 = int_to_ptr.vmem [resolvable:$true] %s123_s27  ;;  %s126_s30 = int_to_ptr.hbm [resolvable:$true] %s125_s30 }
  0x10   :  { %v52_v6 = vrot.slane %v51_v4, 4 }
  0x11   :  { %v60_v7 = vrot.slane %v59_v5, 4 }
  0x12   :  { %v53_v8 = vadd.f32 %v52_v6, %v51_v4 }
  0x13   :  { %v61_v9 = vadd.f32 %v60_v7, %v59_v5 }
  0x14   :  { %v54_v10 = vrot.slane %v53_v8, 2 }
  0x15   :  { %v62_v11 = vrot.slane %v61_v9, 2 }
  0x16   :  { %v55_v12 = vadd.f32 %v54_v10, %v53_v8 }
  0x17   :  { %v63_v13 = vadd.f32 %v62_v11, %v61_v9 }
  0x18   :  { %v56_v14 = vrot.slane %v55_v12, 1 }
  0x19   :  { %v64_v15 = vrot.slane %v63_v13, 1 }
  0x1a   :  { %v57_v16 = vadd.f32 %v56_v14, %v55_v12 }
  0x1b   :  { %v65_v17 = vadd.f32 %v64_v15, %v63_v13 }
  0x1c   :  { %v58_v18 = vmul.f32 0.0625, %v57_v16 }
  0x1d   :  { %v66_v19 = vmul.f32 0.0625, %v65_v17 }
  0x1e   :  { %v67_v20 = vsub.f32 %v47_v0, %v58_v18  ;;  %v68_v21 = vsub.f32 %v48_v1, %v58_v18 }
  0x1f   :  { %v69_v22 = vsub.f32 %v49_v2, %v66_v19  ;;  %v70_v23 = vsub.f32 %v50_v3, %v66_v19 }
  0x20   :  { %v80_v24 = vmul.f32 %v67_v20, %v67_v20  ;;  %v81_v25 = vmul.f32 %v68_v21, %v68_v21 }
  0x21   :  { %v89_v26 = vmul.f32 %v69_v22, %v69_v22  ;;  %v90_v27 = vmul.f32 %v70_v23, %v70_v23  ;;  %v71_v33 = vmul.f32 %v69_v22, %v67_v20  ;;  %v72_v34 = vmul.f32 %v70_v23, %v68_v21 }
  0x22   :  { %v82_v28 = vadd.f32 %v81_v25, %v80_v24 }
  0x23   :  { %v91_v29 = vadd.f32 %v90_v27, %v89_v26  ;;  %v73_v39 = vadd.f32 %v72_v34, %v71_v33 }
  0x24   :  { %v83_v30 = vrot.slane %v82_v28, 4 }
  0x25   :  { %v92_v31 = vrot.slane %v91_v29, 4  ;;  %v74_v44 = vrot.slane %v73_v39, 4 }
  0x26   :  { %v84_v32 = vadd.f32 %v83_v30, %v82_v28 }
  0x27   :  { %v93_v35 = vadd.f32 %v92_v31, %v91_v29  ;;  %v75_v47 = vadd.f32 %v74_v44, %v73_v39 }
  0x28   :  { %v85_v36 = vrot.slane %v84_v32, 2 }
  0x29   :  { %v94_v37 = vrot.slane %v93_v35, 2  ;;  %v76_v51 = vrot.slane %v75_v47, 2 }
  0x2a   :  { %v86_v38 = vadd.f32 %v85_v36, %v84_v32 }
  0x2b   :  { %v95_v40 = vadd.f32 %v94_v37, %v93_v35  ;;  %v77_v53 = vadd.f32 %v76_v51, %v75_v47 }
  0x2c   :  { %v87_v41 = vrot.slane %v86_v38, 1 }
  0x2d   :  { %v96_v42 = vrot.slane %v95_v40, 1  ;;  %v78_v56 = vrot.slane %v77_v53, 1 }
  0x2e   :  { %v88_v43 = vadd.f32 %v87_v41, %v86_v38 }
  0x2f   :  { %v97_v45 = vadd.f32 %v96_v42, %v95_v40  ;;  %v79_v59 = vadd.f32 %v78_v56, %v77_v53 }
  0x31   :  { %v98_v46 = vmul.f32 %v97_v45, %v88_v43 }
  0x33   :  { %vm99_vm0 = vcmp.gt.f32.partialorder %v98_v46, 0.0 }
  0x34   :  { %v100_v48 = vsel %vm99_vm0, %v98_v46, 1.0  ;;  %v152_v50 = vsel %vm99_vm0, 1.0, %v271_v49 }
  0x35   :  { %160 = vrsqrt.f32 %v100_v48  ;;  %117 = vst [vmem:[#allocation8] sm:$0x1] %v152_v50  ;;  %vm107_vm1 = vweird.f32 %v100_v48 }
  0x36   :  { %139 = dma.vmem_to_hbm [thread:$0]  %s135_s1, 16, %s137_s26, [#allocation9]  }
  0x3b   :  { %v161_v52 = vpop.eup %160 }
  0x3c   :  { %v102_v54 = vmul.f32 %v161_v52, %v100_v48  ;;  %vm108_vm2 = vweird.f32 %v161_v52 }
  0x3d   :  { %vm109_vm3 = vmor %vm107_vm1, %vm108_vm2 }
  0x3e   :  { %v103_v55 = vmul.f32 %v161_v52, %v102_v54 }
  0x40   :  { %v104_v57 = vmul.f32 0.5, %v103_v55 }
  0x42   :  { %v105_v58 = vsub.f32 1.5, %v104_v57 }
  0x44   :  { %v106_v60 = vmul.f32 %v161_v52, %v105_v58 }
  0x46   :  { %v110_v61 = vsel %vm109_vm3, %v161_v52, %v106_v60 }
  0x47   :  { %v111_v62 = vmul.f32 %v110_v61, %v79_v59 }
  0x49   :  { %v112_v63 = vand.u32 2147483647, %v111_v62 }
  0x4b   :  { %v113_v0 = vsel %vm99_vm0, %v112_v63, 0.0 }
  0x4c   :  { %114 = vst [vmem:[#allocation7] sm:$0x1] %v113_v0 }
  0x4d   :  { %128 = dma.vmem_to_hbm [thread:$0]  %s124_s27, 16, %s126_s30, [#allocation4]  }
  0x4e   :  { %262 = dma.done.wait [#allocation4], 16  }
  0x4f   :  { %263 = vsyncadd [#allocation4], 4294967280 }
  0x50   :  { %264 = dma.done.wait [#allocation9], 16  }
  0x51   :  { %265 = vsyncadd [#allocation9], 4294967280 }
  0x52   :  { %148 = vsyncpa [#allocation3], 1 }
  0x53   :  { %149 = vsyncpa [#allocation6], 1 }
  0x54   :  { %150 = vsyncpa [#allocation4], 1 }
  0x55   :  { %151 = vsyncpa [#allocation9], 1 }

</bundles_post_ra>
